<compile_context>
chip_gen: v5e
topology: v5e:2x2
jax: 0.10.0
libtpu: 0.0.40
codegen_flags: <defaults>
</compile_context>

<pallas_src>
import functools

import numpy as np
import jax
import jax.numpy as jnp
from jax.experimental import pallas as pl
from jax.experimental.pallas import tpu as pltpu

N_BINS = 15
_LANES = 128
_PAD_VALUE = -1e30  # exp() underflows to 0 and never wins the argmax


def _ece_partial_kernel(logits_ref, labels_ref,
                        count_ref, conf_sum_ref, acc_sum_ref,
                        *, n_bins, n_valid_rows, tiles_per_split):
    p = pl.program_id(0)
    t = pl.program_id(1)

    # Zero the resident accumulator blocks at the start of each row-split.
    @pl.when(t == 0)
    def _init():
        count_ref[...] = jnp.zeros_like(count_ref)
        conf_sum_ref[...] = jnp.zeros_like(conf_sum_ref)
        acc_sum_ref[...] = jnp.zeros_like(acc_sum_ref)

    logits = logits_ref[...].astype(jnp.float32)             # (T, C)
    tile_rows, n_classes = logits.shape

    # confidence = max softmax prob = 1 / sum(exp(x - max)); no (T, C) divide.
    row_max = jnp.max(logits, axis=-1, keepdims=True)         # (T, 1)
    exp_sum = jnp.sum(jnp.exp(logits - row_max), axis=-1, keepdims=True)
    conf = 1.0 / exp_sum                                       # (T, 1)

    # First-occurrence argmax of logits (== argmax of softmax).
    col = jax.lax.broadcasted_iota(jnp.int32, (tile_rows, n_classes), 1)
    pred = jnp.min(jnp.where(logits == row_max, col, jnp.int32(n_classes)),
                   axis=-1, keepdims=True)                     # (T, 1) i32
    correct = (pred == labels_ref[...]).astype(jnp.float32)    # (T, 1)

    # Mask out rows that were added only for row padding.
    tile_idx = p * tiles_per_split + t
    local_row = jax.lax.broadcasted_iota(jnp.int32, (tile_rows, 1), 0)
    valid = (tile_idx * tile_rows + local_row < n_valid_rows).astype(jnp.float32)

    # Equal-width (lo, hi] bins over (0, 1]: bin b covers (b/n, (b+1)/n].
    bin_idx = jnp.clip(
        jnp.ceil(conf * jnp.float32(n_bins)).astype(jnp.int32) - 1,
        0, n_bins - 1)                                         # (T, 1)
    lane = jax.lax.broadcasted_iota(jnp.int32, (tile_rows, _LANES), 1)
    one_hot = jnp.where(lane == bin_idx, valid, 0.0)           # (T, 128) lane-dense

    count_ref[0:1, :] += jnp.sum(one_hot, axis=0, keepdims=True)
    conf_sum_ref[0:1, :] += jnp.sum(one_hot * conf, axis=0, keepdims=True)
    acc_sum_ref[0:1, :] += jnp.sum(one_hot * correct, axis=0, keepdims=True)


def _round_up(x, m):
    return (x + m - 1) // m * m


def ece_loss(logits, labels, n_bins=N_BINS):
    """Pallas ECE. logits: (N, C) float, labels: (N,) int. Returns shape-(1,) f32."""
    logits = jnp.asarray(logits)
    if logits.dtype != jnp.bfloat16:      # keep bf16 inputs bf16 (halves HBM bytes)
        logits = logits.astype(jnp.float32)
    labels = jnp.asarray(labels, jnp.int32).reshape(-1, 1)
    n_rows, n_classes = logits.shape

    # --- tiling --------------------------------------------------------------
    # Row-tile sized so one logits block is ~4 MiB (double-buffered by Pallas).
    bytes_per = jnp.dtype(logits.dtype).itemsize
    block_budget = 4 * 1024 * 1024
    tile_rows = max(8, min(2048, (block_budget // (n_classes * bytes_per)) // 8 * 8))
    tile_rows = min(tile_rows, _round_up(n_rows, 8))
    num_tiles = pl.cdiv(n_rows, tile_rows)
    n_splits = 2 if num_tiles >= 2 else 1   # v7x: 2 TCs; elsewhere a serial loop
    tiles_per_split = pl.cdiv(num_tiles, n_splits)
    padded_rows = n_splits * tiles_per_split * tile_rows

    # --- row padding only (class dim is never padded: block last dim == C) ---
    pad_r = padded_rows - n_rows
    if pad_r:
        logits = jnp.pad(logits, ((0, pad_r), (0, 0)), constant_values=_PAD_VALUE)
        labels = jnp.pad(labels, ((0, pad_r), (0, 0)), constant_values=0)

    kernel = functools.partial(
        _ece_partial_kernel, n_bins=n_bins, n_valid_rows=n_rows,
        tiles_per_split=tiles_per_split)

    row_map = lambda p, t: (p * tiles_per_split + t, 0)
    acc_map = lambda p, t: (p, 0)
    acc_shape = jax.ShapeDtypeStruct((n_splits * 8, _LANES), jnp.float32)

    counts, conf_sums, acc_sums = pl.pallas_call(
        kernel,
        out_shape=(acc_shape, acc_shape, acc_shape),
        grid=(n_splits, tiles_per_split),
        in_specs=[
            pl.BlockSpec((tile_rows, n_classes), row_map),
            pl.BlockSpec((tile_rows, 1), row_map),
        ],
        out_specs=(
            pl.BlockSpec((8, _LANES), acc_map),
            pl.BlockSpec((8, _LANES), acc_map),
            pl.BlockSpec((8, _LANES), acc_map),
        ),
        compiler_params=pltpu.CompilerParams(
            dimension_semantics=("parallel", "arbitrary"),
            vmem_limit_bytes=32 * 1024 * 1024),
    )(logits, labels)

    # Tiny final combine (~45 floats) in plain JAX.
    count = jnp.sum(counts, axis=0)[:n_bins]
    sum_conf = jnp.sum(conf_sums, axis=0)[:n_bins]
    sum_acc = jnp.sum(acc_sums, axis=0)[:n_bins]
    safe = jnp.maximum(count, 1.0)
    prop = count / jnp.float32(n_rows)
    ece = jnp.sum(jnp.where(count > 0.0,
                            jnp.abs(sum_conf / safe - sum_acc / safe) * prop,
                            0.0))
    return ece.reshape(1)


def _ece_reference(logits, labels, n_bins=N_BINS):
    logits = np.asarray(logits, np.float32)
    labels = np.asarray(labels)
    ex = np.exp(logits - logits.max(-1, keepdims=True))
    sm = ex / ex.sum(-1, keepdims=True)
    conf = sm.max(-1)
    pred = sm.argmax(-1)
    acc = (pred == labels).astype(np.float32)
    bounds = np.linspace(0.0, 1.0, n_bins + 1, dtype=np.float32)
    ece = np.float32(0.0)
    for lo, hi in zip(bounds[:-1], bounds[1:]):
        in_bin = (conf > lo) & (conf <= hi)
        prop = in_bin.astype(np.float32).mean()
        if prop > 0:
            ece += np.abs(conf[in_bin].mean() - acc[in_bin].mean()) * prop
    return np.array([ece], np.float32)


if __name__ == "__main__":
    key = jax.random.PRNGKey(0)
    k_logits, k_labels = jax.random.split(key)

    N, C = 16, 32  # N samples, C classes
    logits = jax.random.normal(k_logits, (N, C), dtype=jnp.float32) * 2.0
    labels = jax.random.randint(k_labels, (N,), 0, C, dtype=jnp.int32)

    ece = ece_loss(logits, labels)
    jax.block_until_ready(ece)

    ref = _ece_reference(np.asarray(logits), np.asarray(labels))
    np.testing.assert_allclose(np.asarray(ece), ref, rtol=1e-5, atol=1e-6)

    print("KERNEL_OK")
</pallas_src>

<mosaic_0001>
module attributes {stable_mosaic.version = 11 : i64} {
  func.func @_ece_partial_kernel(%arg0: i32, %arg1: i32, %arg2: memref<16x32xf32, #tpu.memory_space<vmem>>, %arg3: memref<16x1xi32, #tpu.memory_space<vmem>>, %arg4: memref<8x128xf32, #tpu.memory_space<vmem>>, %arg5: memref<8x128xf32, #tpu.memory_space<vmem>>, %arg6: memref<8x128xf32, #tpu.memory_space<vmem>>) attributes {dimension_semantics = [#tpu.dimension_semantics<parallel>, #tpu.dimension_semantics<arbitrary>], iteration_bounds = array<i64: 1, 1>, scalar_prefetch = 0 : i64, scratch_operands = 0 : i64, tpu.core_type = #tpu.core_type<tc>, window_params = [{transform_indices = @transform_0, window_bounds = array<i64: 16, 32>}, {transform_indices = @transform_1, window_bounds = array<i64: 16, 1>}, {transform_indices = @transform_2, window_bounds = array<i64: 8, 128>}, {transform_indices = @transform_3, window_bounds = array<i64: 8, 128>}, {transform_indices = @transform_4, window_bounds = array<i64: 8, 128>}]} {
    %c0_i32 = arith.constant 0 : i32
    %0 = arith.cmpi eq, %arg1, %c0_i32 : i32
    %1 = arith.extui %0 : i1 to i32
    %c0_i32_0 = arith.constant 0 : i32
    %2 = arith.cmpi ne, %1, %c0_i32_0 : i32
    scf.if %2 {
      %cst_27 = arith.constant 0.000000e+00 : f32
      %70 = vector.broadcast %cst_27 : f32 to vector<8x128xf32>
      %c0_28 = arith.constant 0 : index
      %c0_29 = arith.constant 0 : index
      %71 = vector.load %arg4[%c0_28, %c0_29] : memref<8x128xf32, #tpu.memory_space<vmem>>, vector<8x128xf32>
      tpu.vector_store %arg4[%c0_28, %c0_29], %70 {strides = array<i32>} : memref<8x128xf32, #tpu.memory_space<vmem>>, vector<8x128xf32>,
      %cst_30 = arith.constant 0.000000e+00 : f32
      %72 = vector.broadcast %cst_30 : f32 to vector<8x128xf32>
      %c0_31 = arith.constant 0 : index
      %c0_32 = arith.constant 0 : index
      %73 = vector.load %arg5[%c0_31, %c0_32] : memref<8x128xf32, #tpu.memory_space<vmem>>, vector<8x128xf32>
      tpu.vector_store %arg5[%c0_31, %c0_32], %72 {strides = array<i32>} : memref<8x128xf32, #tpu.memory_space<vmem>>, vector<8x128xf32>,
      %cst_33 = arith.constant 0.000000e+00 : f32
      %74 = vector.broadcast %cst_33 : f32 to vector<8x128xf32>
      %c0_34 = arith.constant 0 : index
      %c0_35 = arith.constant 0 : index
      %75 = vector.load %arg6[%c0_34, %c0_35] : memref<8x128xf32, #tpu.memory_space<vmem>>, vector<8x128xf32>
      tpu.vector_store %arg6[%c0_34, %c0_35], %74 {strides = array<i32>} : memref<8x128xf32, #tpu.memory_space<vmem>>, vector<8x128xf32>,
    } else {
    }
    %c0 = arith.constant 0 : index
    %c0_1 = arith.constant 0 : index
    %3 = vector.load %arg2[%c0, %c0_1] : memref<16x32xf32, #tpu.memory_space<vmem>>, vector<16x32xf32>
    %cst = arith.constant dense<0xFF800000> : vector<16xf32>
    %4 = vector.multi_reduction <maximumf>, %3, %cst [1] : vector<16x32xf32> to vector<16xf32>
    %5 = vector.shape_cast %4 : vector<16xf32> to vector<16x1xf32>
    %6 = vector.broadcast %5 : vector<16x1xf32> to vector<16x32xf32>
    %7 = arith.subf %3, %6 : vector<16x32xf32>
    %8 = math.exp %7 : vector<16x32xf32>
    %cst_2 = arith.constant dense<0.000000e+00> : vector<16xf32>
    %9 = vector.multi_reduction <add>, %8, %cst_2 [1] : vector<16x32xf32> to vector<16xf32>
    %10 = vector.shape_cast %9 : vector<16xf32> to vector<16x1xf32>
    %cst_3 = arith.constant 1.000000e+00 : f32
    %11 = vector.broadcast %cst_3 : f32 to vector<16x1xf32>
    %12 = arith.divf %11, %10 : vector<16x1xf32>
    %13 = tpu.iota {dimensions = array<i32: 1>} : vector<16x32xi32>
    %14 = vector.broadcast %5 : vector<16x1xf32> to vector<16x32xf32>
    %15 = arith.cmpf oeq, %3, %14 : vector<16x32xf32>
    %c32_i32 = arith.constant 32 : i32
    %16 = vector.broadcast %c32_i32 : i32 to vector<16x32xi32>
    %17 = arith.select %15, %13, %16 : vector<16x32xi1>, vector<16x32xi32>
    %cst_4 = arith.constant dense<2147483647> : vector<16xi32>
    %18 = vector.multi_reduction <minsi>, %17, %cst_4 [1] : vector<16x32xi32> to vector<16xi32>
    %19 = vector.shape_cast %18 : vector<16xi32> to vector<16x1xi32>
    %c0_5 = arith.constant 0 : index
    %c0_6 = arith.constant 0 : index
    %20 = vector.load %arg3[%c0_5, %c0_6] : memref<16x1xi32, #tpu.memory_space<vmem>>, vector<16x1xi32>
    %21 = arith.cmpi eq, %19, %20 : vector<16x1xi32>
    %22 = arith.extui %21 : vector<16x1xi1> to vector<16x1xi32>
    %23 = arith.sitofp %22 : vector<16x1xi32> to vector<16x1xf32>
    %c1_i32 = arith.constant 1 : i32
    %24 = arith.muli %arg0, %c1_i32 : i32
    %25 = arith.addi %24, %arg1 : i32
    %26 = tpu.iota {dimensions = array<i32: 0>} : vector<16x1xi32>
    %c16_i32 = arith.constant 16 : i32
    %27 = arith.muli %25, %c16_i32 : i32
    %28 = vector.broadcast %27 : i32 to vector<16x1xi32>
    %29 = arith.addi %28, %26 : vector<16x1xi32>
    %c16_i32_7 = arith.constant 16 : i32
    %30 = vector.broadcast %c16_i32_7 : i32 to vector<16x1xi32>
    %31 = arith.cmpi slt, %29, %30 : vector<16x1xi32>
    %32 = arith.extui %31 : vector<16x1xi1> to vector<16x1xi32>
    %33 = arith.sitofp %32 : vector<16x1xi32> to vector<16x1xf32>
    %cst_8 = arith.constant 1.500000e+01 : f32
    %34 = vector.broadcast %cst_8 : f32 to vector<16x1xf32>
    %35 = arith.mulf %12, %34 : vector<16x1xf32>
    %36 = math.ceil %35 : vector<16x1xf32>
    %37 = arith.fptosi %36 : vector<16x1xf32> to vector<16x1xi32>
    %c1_i32_9 = arith.constant 1 : i32
    %38 = vector.broadcast %c1_i32_9 : i32 to vector<16x1xi32>
    %39 = arith.subi %37, %38 : vector<16x1xi32>
    %c0_i32_10 = arith.constant 0 : i32
    %c14_i32 = arith.constant 14 : i32
    %40 = vector.broadcast %c0_i32_10 : i32 to vector<16x1xi32>
    %41 = arith.maxsi %40, %39 : vector<16x1xi32>
    %42 = vector.broadcast %c14_i32 : i32 to vector<16x1xi32>
    %43 = arith.minsi %42, %41 : vector<16x1xi32>
    %44 = tpu.iota {dimensions = array<i32: 1>} : vector<16x128xi32>
    %45 = vector.broadcast %43 : vector<16x1xi32> to vector<16x128xi32>
    %46 = arith.cmpi eq, %44, %45 : vector<16x128xi32>
    %cst_11 = arith.constant 0.000000e+00 : f32
    %47 = vector.shape_cast %33 : vector<16x1xf32> to vector<16x1xf32>
    %48 = vector.broadcast %47 : vector<16x1xf32> to vector<16x128xf32>
    %49 = vector.broadcast %cst_11 : f32 to vector<16x128xf32>
    %50 = arith.select %46, %48, %49 : vector<16x128xi1>, vector<16x128xf32>
    %c0_12 = arith.constant 0 : index
    %c0_13 = arith.constant 0 : index
    %51 = vector.load %arg4[%c0_12, %c0_13] : memref<8x128xf32, #tpu.memory_space<vmem>>, vector<1x128xf32>
    %cst_14 = arith.constant dense<0.000000e+00> : vector<128xf32>
    %52 = vector.multi_reduction <add>, %50, %cst_14 [0] : vector<16x128xf32> to vector<128xf32>
    %53 = vector.shape_cast %52 : vector<128xf32> to vector<1x128xf32>
    %54 = arith.addf %51, %53 : vector<1x128xf32>
    %c0_15 = arith.constant 0 : index
    %c0_16 = arith.constant 0 : index
    %55 = vector.load %arg4[%c0_15, %c0_16] : memref<8x128xf32, #tpu.memory_space<vmem>>, vector<1x128xf32>
    tpu.vector_store %arg4[%c0_15, %c0_16], %54 {strides = array<i32>} : memref<8x128xf32, #tpu.memory_space<vmem>>, vector<1x128xf32>,
    %c0_17 = arith.constant 0 : index
    %c0_18 = arith.constant 0 : index
    %56 = vector.load %arg5[%c0_17, %c0_18] : memref<8x128xf32, #tpu.memory_space<vmem>>, vector<1x128xf32>
    %57 = vector.broadcast %12 : vector<16x1xf32> to vector<16x128xf32>
    %58 = arith.mulf %50, %57 : vector<16x128xf32>
    %cst_19 = arith.constant dense<0.000000e+00> : vector<128xf32>
    %59 = vector.multi_reduction <add>, %58, %cst_19 [0] : vector<16x128xf32> to vector<128xf32>
    %60 = vector.shape_cast %59 : vector<128xf32> to vector<1x128xf32>
    %61 = arith.addf %56, %60 : vector<1x128xf32>
    %c0_20 = arith.constant 0 : index
    %c0_21 = arith.constant 0 : index
    %62 = vector.load %arg5[%c0_20, %c0_21] : memref<8x128xf32, #tpu.memory_space<vmem>>, vector<1x128xf32>
    tpu.vector_store %arg5[%c0_20, %c0_21], %61 {strides = array<i32>} : memref<8x128xf32, #tpu.memory_space<vmem>>, vector<1x128xf32>,
    %c0_22 = arith.constant 0 : index
    %c0_23 = arith.constant 0 : index
    %63 = vector.load %arg6[%c0_22, %c0_23] : memref<8x128xf32, #tpu.memory_space<vmem>>, vector<1x128xf32>
    %64 = vector.broadcast %23 : vector<16x1xf32> to vector<16x128xf32>
    %65 = arith.mulf %50, %64 : vector<16x128xf32>
    %cst_24 = arith.constant dense<0.000000e+00> : vector<128xf32>
    %66 = vector.multi_reduction <add>, %65, %cst_24 [0] : vector<16x128xf32> to vector<128xf32>
    %67 = vector.shape_cast %66 : vector<128xf32> to vector<1x128xf32>
    %68 = arith.addf %63, %67 : vector<1x128xf32>
    %c0_25 = arith.constant 0 : index
    %c0_26 = arith.constant 0 : index
    %69 = vector.load %arg6[%c0_25, %c0_26] : memref<8x128xf32, #tpu.memory_space<vmem>>, vector<1x128xf32>
    tpu.vector_store %arg6[%c0_25, %c0_26], %68 {strides = array<i32>} : memref<8x128xf32, #tpu.memory_space<vmem>>, vector<1x128xf32>,
    return
  }
  func.func @transform_0(%arg0: i32, %arg1: i32) -> (i32, i32) {
    %c1_i32 = arith.constant 1 : i32
    %0 = arith.muli %arg0, %c1_i32 : i32
    %1 = arith.addi %0, %arg1 : i32
    %c0_i32 = arith.constant 0 : i32
    %c0_i32_0 = arith.constant 0 : i32
    return %1, %c0_i32 : i32, i32
  }
  func.func @transform_1(%arg0: i32, %arg1: i32) -> (i32, i32) {
    %c1_i32 = arith.constant 1 : i32
    %0 = arith.muli %arg0, %c1_i32 : i32
    %1 = arith.addi %0, %arg1 : i32
    %c0_i32 = arith.constant 0 : i32
    %c0_i32_0 = arith.constant 0 : i32
    return %1, %c0_i32 : i32, i32
  }
  func.func @transform_2(%arg0: i32, %arg1: i32) -> (i32, i32) {
    %c0_i32 = arith.constant 0 : i32
    %c0_i32_0 = arith.constant 0 : i32
    return %arg0, %c0_i32 : i32, i32
  }
  func.func @transform_3(%arg0: i32, %arg1: i32) -> (i32, i32) {
    %c0_i32 = arith.constant 0 : i32
    %c0_i32_0 = arith.constant 0 : i32
    return %arg0, %c0_i32 : i32, i32
  }
  func.func @transform_4(%arg0: i32, %arg1: i32) -> (i32, i32) {
    %c0_i32 = arith.constant 0 : i32
    %c0_i32_0 = arith.constant 0 : i32
    return %arg0, %c0_i32 : i32, i32
  }
}

</mosaic_0001>

<bundles_post_ra>
// kernel: tpu_custom_call.1
= control target key start
LH: loop header
LB: loop body
LE: loop exit
PB: predicated region body
PF: predicated region fallthrough
CT: control target
= control target key end

     0   :  { %10 = vsyncpa [#allocation3], 0  ;;  %vm69_vm0 = vcmask 261120   ;;  %s481_s0 = inlined_call_operand.vmem [shape: f32[16,32], index: 0, kind: input, shape index: {}]   ;;  %s482_s1 = inlined_call_operand.vmem [shape: s32[16,1], index: 1, kind: input, shape index: {}]   ;;  %s483_s2 = inlined_call_operand.hbm [shape: f32[8,128], index: 2, kind: output, shape index: {0}]   ;;  %s484_s3 = inlined_call_operand.hbm [shape: f32[8,128], index: 3, kind: output, shape index: {1}]   ;;  %s485_s4 = inlined_call_operand.hbm [shape: f32[8,128], index: 4, kind: output, shape index: {2}]  }
   0x1   :  { %v67_v0 = vld [vmem:[%s481_s0] sm:$0xff] }
   0x2   :  { %11 = vsyncpa [#allocation5], 0  ;;  %v70_v1 = vsel %vm69_vm0, %v67_v0, -inf  ;;  %v68_v2 = vld [vmem:[%s481_s0 + $0x8] sm:$0xff]  ;;  %v118_v4 = vlaneseq  ;;  %v403_v30 = vmov 0.0   ;;  %s258_s20 = sshll.u32 %s484_s3, 4  ;;  %s259_s20 = int_to_ptr.hbm [resolvable:$true] %s258_s20 }
   0x3   :  { %71 = vmax.xlane.f32.xlu0 %v70_v1  ;;  %v73_v3 = vsel %vm69_vm0, %v68_v2, -inf  ;;  %64 = vst [vmem:[#allocation2] sm:$0xff] %v403_v30  ;;  %s405_s21 = smov [#allocation4]   ;;  %s406_s23 = smov [#allocation2]  }
   0x4   :  { %v441_v5 = vand.u32 127, %v118_v4  ;;  %65 = vst [vmem:[#allocation4] sm:$0xff] %v403_v30  ;;  %s256_s22 = sshll.u32 %s405_s21, 4  ;;  %s245_s24 = sshll.u32 %s406_s23, 4  ;;  %s257_s22 = int_to_ptr.vmem [resolvable:$true] %s256_s22  ;;  %s246_s24 = int_to_ptr.vmem [resolvable:$true] %s245_s24 }
   0x5   :  { %66 = vst [vmem:[#allocation6] sm:$0xff] %v403_v30  ;;  %s247_s27 = sshll.u32 %s483_s2, 4  ;;  %s269_s7 = sshll.u32 %s485_s4, 4  ;;  %s248_s27 = int_to_ptr.hbm [resolvable:$true] %s247_s27  ;;  %s270_s7 = int_to_ptr.hbm [resolvable:$true] %s269_s7 }
   0xb   :  { %74 = vmax.xlane.f32.xlu0 %v73_v3 }
  0x76   :  { %v72_v6 = vpop.xlane.xlu0 %71 }
  0x77   :  { %v76_v7 = vsub.f32 %v67_v0, %v72_v6  ;;  %vm120_vm1 = vcmp.eq.f32.partialorder %v67_v0, %v72_v6 }
  0x78   :  { %v122_v8 = vsel %vm120_vm1, %v441_v5, 32 }
  0x79   :  { %v78_v9 = vmul.f32 1.442695, %v76_v7  ;;  %v124_v10 = vsel %vm69_vm0, %v122_v8, 2147483647 }
  0x7a   :  { %v126_v11 = vshra.s32 %v124_v10, 16  ;;  %v125_v24 = vand.u32 65535, %v124_v10 }
  0x7b   :  { %319 = vpow2.f32 %v78_v9 }
  0x7c   :  { %v128_v12 = vcvt.s32.f32 %v126_v11  ;;  %v127_v26 = vcvt.s32.f32 %v125_v24 }
  0x7e   :  { %129 = vmin.xlane.f32.xlu1 %v128_v12  ;;  %v75_v13 = vpop.xlane.xlu0 %74 }
  0x7f   :  { %v77_v14 = vsub.f32 %v68_v2, %v75_v13  ;;  %vm121_vm2 = vcmp.eq.f32.partialorder %v68_v2, %v75_v13 }
  0x80   :  { %v123_v15 = vsel %vm121_vm2, %v441_v5, 32 }
  0x81   :  { %v320_v16 = vpop.eup %319  ;;  %v80_v17 = vmul.f32 1.442695, %v77_v14  ;;  %v139_v18 = vsel %vm69_vm0, %v123_v15, 2147483647 }
  0x82   :  { %v82_v19 = vsel %vm69_vm0, %v320_v16, 0.0  ;;  %v141_v20 = vshra.s32 %v139_v18, 16  ;;  %v140_v28 = vand.u32 65535, %v139_v18 }
  0x83   :  { %83 = vadd.xlane.f32.xlu0 %v82_v19  ;;  %321 = vpow2.f32 %v80_v17  ;;  %v196_v19 = vld [vmem:[#allocation2] sm:$0x1] }
  0x84   :  { %v143_v21 = vcvt.s32.f32 %v141_v20  ;;  %v142_v32 = vcvt.s32.f32 %v140_v28 }
  0x86   :  { %144 = vmin.xlane.f32.xlu1 %v143_v21 }
  0x89   :  { %v322_v22 = vpop.eup %321 }
  0x8a   :  { %v85_v23 = vsel %vm69_vm0, %v322_v22, 0.0  ;;  %v206_v22 = vld [vmem:[#allocation4] sm:$0x1] }
  0x8e   :  { %86 = vadd.xlane.f32.xlu1 %v85_v23 }
  0xf1   :  { %v449_v25 = vpop.xlane.xlu1 %129 }
  0xf2   :  { %vm131_vm3 = vcmp.eq.f32.partialorder %v128_v12, %v449_v25  ;;  %v136_v28 = vcvt.f32.s32 %v449_v25 }
  0xf3   :  { %v132_v27 = vsel %vm131_vm3, %v127_v26, inf  ;;  %v404_v26 = vmov 0  }
  0xf4   :  { %133 = vmin.xlane.f32.xlu2 %v132_v27  ;;  %318 = vset.pattern.permute.xlu0 %v404_v26 }
  0xf5   :  { %312 = vset.pattern.permute.xlu2 %v404_v26 }
  0xf6   :  { %v84_v29 = vpop.xlane.xlu0 %83 }
  0xf7   :  { %323 = vrcp.f32 %v84_v29  ;;  %v99_v37 = vand.u32 2147483648, %v84_v29  ;;  %v97_v40 = vand.u32 2147483647, %v84_v29  ;;  %vm93_vm6 = vweird.f32 %v84_v29 }
  0xf9   :  { %v455_v31 = vpop.xlane.xlu1 %144  ;;  %v100_v42 = vor.u32 1.1754944e-38, %v99_v37  ;;  %vm98_vm8 = vcmp.eq.f32.partialorder %v97_v40, 8.507059e+37 }
  0xfa   :  { %vm146_vm4 = vcmp.eq.f32.partialorder %v143_v21, %v455_v31 }
  0xfb   :  { %v147_v33 = vsel %vm146_vm4, %v142_v32, inf  ;;  %v137_v32 = vshll.u32 %v136_v28, 16 }
  0xfc   :  { %148 = vmin.xlane.f32.xlu2 %v147_v33  ;;  %v151_v33 = vcvt.f32.s32 %v455_v31 }
  0xfd   :  { %v324_v34 = vpop.eup %323 }
  0xfe   :  { %v89_v35 = vmul.f32 %v324_v34, %v84_v29  ;;  %vm94_vm5 = vweird.f32 %v324_v34  ;;  %v152_v37 = vshll.u32 %v151_v33, 16 }
  0xff   :  { %vm95_vm7 = vmor %vm93_vm6, %vm94_vm5 }
 0x100   :  { %v90_v36 = vsub.f32 1.0, %v89_v35  ;;  %v154_v35 = vld [vmem:[%s482_s1] sm:$0xff] }
 0x101   :  { %v87_v38 = vpop.xlane.xlu1 %86 }
 0x102   :  { %v91_v39 = vmul.f32 %v324_v34, %v90_v36  ;;  %325 = vrcp.f32 %v87_v38  ;;  %v114_v50 = vand.u32 2147483648, %v87_v38  ;;  %v112_v53 = vand.u32 2147483647, %v87_v38 }
 0x103   :  { %vm108_vm10 = vweird.f32 %v87_v38 }
 0x104   :  { %v92_v41 = vadd.f32 %v324_v34, %v91_v39  ;;  %v115_v56 = vor.u32 1.1754944e-38, %v114_v50  ;;  %vm113_vm13 = vcmp.eq.f32.partialorder %v112_v53, 8.507059e+37  ;;  %v155_v39 = vld [vmem:[%s482_s1 + $0x8] sm:$0xff]  ;;  %v218_v53 = vld [vmem:[#allocation6] sm:$0x1]  ;;  %s407_s1 = smov [#allocation6]  }
 0x105   :  { %s267_s2 = sshll.u32 %s407_s1, 4  ;;  %s268_s2 = int_to_ptr.vmem [resolvable:$true] %s267_s2 }
 0x106   :  { %v96_v43 = vsel %vm95_vm7, %v324_v34, %v92_v41 }
 0x107   :  { %v101_v44 = vsel %vm98_vm8, %v100_v42, %v96_v43 }
 0x108   :  { %v326_v45 = vpop.eup %325  ;;  %v176_v46 = vmul.f32 15.0, %v101_v44 }
 0x109   :  { %v104_v47 = vmul.f32 %v326_v45, %v87_v38  ;;  %vm109_vm9 = vweird.f32 %v326_v45 }
 0x10a   :  { %v178_v48 = vceil.f32 %v176_v46  ;;  %vm110_vm11 = vmor %vm108_vm10, %vm109_vm9 }
 0x10b   :  { %v105_v49 = vsub.f32 1.0, %v104_v47 }
 0x10c   :  { %v304_v51 = vcvt.f32.s32 %v178_v48 }
 0x10d   :  { %v106_v52 = vmul.f32 %v326_v45, %v105_v49 }
 0x10e   :  { %v301_v54 = vadd.s32 4294967295, %v304_v51 }
 0x10f   :  { %v107_v55 = vadd.f32 %v326_v45, %v106_v52 }
 0x110   :  { %vm184_vm12 = vcmp.gt.s32.totalorder %v301_v54, 0 }
 0x111   :  { %v111_v57 = vsel %vm110_vm11, %v326_v45, %v107_v55  ;;  %v185_v59 = vsel %vm184_vm12, %v301_v54, 0 }
 0x112   :  { %v116_v58 = vsel %vm113_vm13, %v115_v56, %v111_v57  ;;  %vm188_vm14 = vcmp.lt.s32.totalorder %v185_v59, 14 }
 0x113   :  { %v177_v60 = vmul.f32 15.0, %v116_v58  ;;  %v189_v63 = vsel %vm188_vm14, %v185_v59, 14 }
 0x114   :  { %vm192_vm0 = vcmp.eq.s32.totalorder %v441_v5, %v189_v63 }
 0x115   :  { %v179_v61 = vceil.f32 %v177_v60  ;;  %v194_v3 = vsel %vm192_vm0, 1.0, %v403_v30 }
 0x116   :  { %v207_v7 = vmul.f32 %v194_v3, %v101_v44 }
 0x117   :  { %v306_v62 = vcvt.f32.s32 %v179_v61 }
 0x119   :  { %v302_v0 = vadd.s32 4294967295, %v306_v62 }
 0x11b   :  { %vm186_vm15 = vcmp.gt.s32.totalorder %v302_v0, 0 }
 0x11c   :  { %v187_v1 = vsel %vm186_vm15, %v302_v0, 0 }
 0x11d   :  { %vm190_vm1 = vcmp.lt.s32.totalorder %v187_v1, 14 }
 0x11e   :  { %v191_v2 = vsel %vm190_vm1, %v187_v1, 14 }
 0x11f   :  { %vm193_vm2 = vcmp.eq.s32.totalorder %v441_v5, %v191_v2 }
 0x120   :  { %v195_v4 = vsel %vm193_vm2, 1.0, %v403_v30 }
 0x121   :  { %v197_v6 = vadd.f32 %v195_v4, %v194_v3  ;;  %v208_v8 = vmul.f32 %v195_v4, %v116_v58 }
 0x123   :  { %v198_v9 = vrot.slane %v197_v6, 4  ;;  %v209_v10 = vadd.f32 %v208_v8, %v207_v7 }
 0x125   :  { %v199_v11 = vadd.f32 %v198_v9, %v197_v6  ;;  %v210_v12 = vrot.slane %v209_v10, 4 }
 0x127   :  { %v200_v13 = vrot.slane %v199_v11, 2  ;;  %v211_v14 = vadd.f32 %v210_v12, %v209_v10 }
 0x129   :  { %v212_v15 = vrot.slane %v211_v14, 2  ;;  %v201_v16 = vadd.f32 %v200_v13, %v199_v11 }
 0x12b   :  { %v213_v17 = vadd.f32 %v212_v15, %v211_v14  ;;  %v202_v18 = vrot.slane %v201_v16, 1 }
 0x12d   :  { %v214_v20 = vrot.slane %v213_v17, 1  ;;  %v203_v21 = vadd.f32 %v202_v18, %v201_v16 }
 0x12f   :  { %v215_v5 = vadd.f32 %v214_v20, %v213_v17  ;;  %v204_v23 = vadd.f32 %v203_v21, %v196_v19 }
 0x131   :  { %v216_v24 = vadd.f32 %v215_v5, %v206_v22  ;;  %205 = vst [vmem:[#allocation2] sm:$0x1] %v204_v23 }
 0x132   :  { %250 = dma.vmem_to_hbm [thread:$0]  %s246_s24, 128, %s248_s27, [#allocation3]  }
 0x133   :  { %217 = vst [vmem:[#allocation4] sm:$0x1] %v216_v24 }
 0x134   :  { %261 = dma.vmem_to_hbm [thread:$0]  %s257_s22, 128, %s259_s20, [#allocation5]  }
 0x167   :  { %v134_v27 = vpop.xlane.xlu2 %133 }
 0x168   :  { %v135_v29 = vcvt.f32.s32 %v134_v27 }
 0x16a   :  { %v138_v34 = vadd.s32 %v137_v32, %v135_v29 }
 0x16c   :  { %vm156_vm3 = vcmp.eq.s32.totalorder %v138_v34, %v154_v35 }
 0x16d   :  { %v299_v40 = vsel %vm156_vm3, 1.0, %v403_v30 }
 0x16f   :  { %v149_v36 = vpop.xlane.xlu2 %148 }
 0x170   :  { %v150_v38 = vcvt.f32.s32 %v149_v36 }
 0x172   :  { %v153_v25 = vadd.s32 %v152_v37, %v150_v38 }
 0x174   :  { %vm157_vm4 = vcmp.eq.s32.totalorder %v153_v25, %v155_v39 }
 0x175   :  { %v300_v41 = vsel %vm157_vm4, 1.0, %v403_v30 }
 0x176   :  { %v313_v31 = vpack.i.bf16 %v300_v41, %v299_v40 }
 0x178   :  { %314 = vperm.xlu2 %312, %v313_v31  }
 0x1d2   :  { %v315_v42 = vpop.permute.xlu2 %314 }
 0x1d3   :  { %v317_v43 = vunpack.i.h.bf16 %v315_v42  ;;  %v316_v44 = vunpack.i.l.bf16 %v315_v42 }
 0x1d5   :  { %v230_v45 = vmul.f32 %v317_v43, %v195_v4  ;;  %v229_v46 = vmul.f32 %v316_v44, %v194_v3 }
 0x1d7   :  { %v231_v47 = vadd.f32 %v230_v45, %v229_v46 }
 0x1d9   :  { %v232_v48 = vrot.slane %v231_v47, 4 }
 0x1db   :  { %v233_v49 = vadd.f32 %v232_v48, %v231_v47 }
 0x1dd   :  { %v234_v50 = vrot.slane %v233_v49, 2 }
 0x1df   :  { %v235_v51 = vadd.f32 %v234_v50, %v233_v49 }
 0x1e1   :  { %v236_v52 = vrot.slane %v235_v51, 1 }
 0x1e3   :  { %v237_v30 = vadd.f32 %v236_v52, %v235_v51 }
 0x1e5   :  { %v238_v54 = vadd.f32 %v237_v30, %v218_v53 }
 0x1e7   :  { %239 = vst [vmem:[#allocation6] sm:$0x1] %v238_v54 }
 0x1e8   :  { %272 = dma.vmem_to_hbm [thread:$0]  %s268_s2, 128, %s270_s7, [#allocation5]  }
 0x1e9   :  { %399 = dma.done.wait [#allocation3], 128  }
 0x1ea   :  { %400 = vsyncadd [#allocation3], 4294967168 }
 0x1eb   :  { %401 = dma.done.wait [#allocation5], 256  }
 0x1ec   :  { %402 = vsyncadd [#allocation5], 4294967040 }
 0x1ed   :  { %285 = vsyncpa [#allocation3], 1 }
 0x1ee   :  { %286 = vsyncpa [#allocation5], 1 }

</bundles_post_ra>
